<compile_context>
chip_gen: v6e
topology: v6e:2x2x1
jax: 0.10.0
libtpu: 0.0.40
codegen_flags: <defaults>
</compile_context>

<pallas_src>
import jax
import jax.numpy as jnp
from jax.experimental import pallas as pl
from jax.experimental.pallas import tpu as pltpu


def _chomp_copy_kernel(x_ref, o_ref):
    # Pure tile copy.  The ragged tail (rows beyond N*C, timesteps beyond
    # L_out) is handled by Pallas' out-of-bounds read-padding / store-masking.
    o_ref[...] = x_ref[...]


def _round_up(x: int, m: int) -> int:
    return ((x + m - 1) // m) * m


def chomp1d(x: jax.Array, chomp_size: int) -> jax.Array:
    """Pallas equivalent of Chomp1d.forward: x[:, :, :-chomp_size] (contiguous)."""
    if chomp_size == 0:
        # Reused with padding == 0 -> no-op, skip the kernel launch entirely.
        return x

    n, c, l = x.shape
    l_out = l - chomp_size
    assert l_out > 0, "chomp_size must be smaller than the temporal length"

    # Flatten (N, C) into one dense row axis so the sublane dim stays packed
    # even when C is small (free reshape: memory is already contiguous).
    rows = n * c
    x2 = x.reshape(rows, l)

    # Sublane granularity by dtype: 8 rows for f32, 16 for bf16, 32 for int8.
    itemsize = jnp.dtype(x.dtype).itemsize
    sublane = 8 * max(1, 4 // itemsize)

    # Lane-dense temporal tiles (multiple of 128) and sublane-aligned row
    # tiles.  Sizes on the larger side so the ~0.35us per-grid-step overhead
    # stays amortized, while the double-buffered in+out working set stays at
    # a few MiB (safe on v7x's 64 MiB VMEM).
    tl = min(512, _round_up(l_out, 128))
    tm = min(256, _round_up(rows, sublane))

    grid = (pl.cdiv(rows, tm), pl.cdiv(l_out, tl))

    out2 = pl.pallas_call(
        _chomp_copy_kernel,
        out_shape=jax.ShapeDtypeStruct((rows, l_out), x.dtype),
        grid=grid,
        # Prefix slice: block (i, j) of the output comes from the same
        # element offsets in the (longer) input, so the index maps coincide.
        in_specs=[pl.BlockSpec((tm, tl), lambda i, j: (i, j))],
        out_specs=pl.BlockSpec((tm, tl), lambda i, j: (i, j)),
        compiler_params=pltpu.CompilerParams(
            dimension_semantics=("parallel", "parallel"),
            vmem_limit_bytes=32 * 1024 * 1024,
        ),
    )(x2)

    return out2.reshape(n, c, l_out)


if __name__ == "__main__":
    key = jax.random.PRNGKey(0)

    # Case 1: small TCN-block-like shape (batch, channels, seq).
    N, C, L = 2, 4, 16
    chomp_size = 3
    x = jax.random.normal(key, (N, C, L), dtype=jnp.float32)

    y = jax.block_until_ready(chomp1d(x, chomp_size))
    ref = x[:, :, :-chomp_size]
    assert y.shape == (N, C, L - chomp_size), y.shape
    assert y.dtype == x.dtype
    assert jnp.array_equal(y, ref), "Pallas Chomp1d output mismatch (case 1)"

    # Case 2: longer sequence so the temporal grid has multiple lane-dense
    # blocks plus a masked tail block (exercises tiling + boundary masking).
    key2 = jax.random.PRNGKey(0)
    N2, C2, L2, chomp2 = 2, 4, 300, 5
    x2 = jax.random.normal(key2, (N2, C2, L2), dtype=jnp.float32)
    y2 = jax.block_until_ready(chomp1d(x2, chomp2))
    ref2 = x2[:, :, :-chomp2]
    assert y2.shape == (N2, C2, L2 - chomp2), y2.shape
    assert jnp.array_equal(y2, ref2), "Pallas Chomp1d output mismatch (case 2)"

    # Case 3: chomp_size == 0 short-circuit (no kernel launch).
    y3 = chomp1d(x, 0)
    assert jnp.array_equal(y3, x)

    print("KERNEL_OK")
</pallas_src>

<mosaic_0001>
module attributes {stable_mosaic.version = 11 : i64} {
  func.func @_chomp_copy_kernel(%arg0: i32, %arg1: i32, %arg2: memref<8x128xf32, #tpu.memory_space<vmem>>, %arg3: memref<8x128xf32, #tpu.memory_space<vmem>>) attributes {dimension_semantics = [#tpu.dimension_semantics<parallel>, #tpu.dimension_semantics<parallel>], iteration_bounds = array<i64: 1, 1>, scalar_prefetch = 0 : i64, scratch_operands = 0 : i64, tpu.core_type = #tpu.core_type<tc>, window_params = [{transform_indices = @transform_0, window_bounds = array<i64: 8, 128>}, {transform_indices = @transform_1, window_bounds = array<i64: 8, 128>}]} {
    %c0 = arith.constant 0 : index
    %c0_0 = arith.constant 0 : index
    %0 = vector.load %arg2[%c0, %c0_0] : memref<8x128xf32, #tpu.memory_space<vmem>>, vector<8x128xf32>
    %c0_1 = arith.constant 0 : index
    %c0_2 = arith.constant 0 : index
    %1 = vector.load %arg3[%c0_1, %c0_2] : memref<8x128xf32, #tpu.memory_space<vmem>>, vector<8x128xf32>
    tpu.vector_store %arg3[%c0_1, %c0_2], %0 {strides = array<i32>} : memref<8x128xf32, #tpu.memory_space<vmem>>, vector<8x128xf32>,
    return
  }
  func.func @transform_0(%arg0: i32, %arg1: i32) -> (i32, i32) {
    %c0_i32 = arith.constant 0 : i32
    return %arg0, %arg1 : i32, i32
  }
  func.func @transform_1(%arg0: i32, %arg1: i32) -> (i32, i32) {
    %c0_i32 = arith.constant 0 : i32
    return %arg0, %arg1 : i32, i32
  }
}

</mosaic_0001>

<bundles_post_ra>
// kernel: tpu_custom_call.1
= control target key start
LH: loop header
LB: loop body
LE: loop exit
PB: predicated region body
PF: predicated region fallthrough
CT: control target
= control target key end

     0   :  { %6 = vsyncpa [#allocation3], 0  ;;  %s102_s0 = inlined_call_operand.hbm [shape: f32[8,16], index: 0, kind: input, shape index: {}]   ;;  %s103_s1 = inlined_call_operand.hbm [shape: f32[8,13], index: 1, kind: output, shape index: {}]  }
   0x1   :  { %7 = vsyncpa [#allocation4], 0  ;;  %s84_s6 = smov [#allocation2]  }
   0x2   :  { %s14_s7 = sshll.u32 %s84_s6, 4  ;;  %s15_s7 = int_to_ptr.vmem [resolvable:$true] %s14_s7 }
   0x3   :  { %s48_s8 = scalar_lea.vmem %s15_s7, 128  ;;  %p53_p1 = scmp.lt.s32.totalorder %s15_s7, %s15_s7 }
   0x4   :  { %p49_p0 = scmp.ne.s32.totalorder %s15_s7, %s48_s8  ;;  %p54_p2 = scmp.lt.s32.totalorder %s48_s8, %s48_s8 }
   0x6   :  { %p55_p3 = por %p54_p2, %p53_p1 }
   0x8   :  { %p56_p4 = pnand %p55_p3, %p49_p0 }
   0xa   :  { %59 = shalt.err (!%p56_p4)
}
   0xb   :  { %17 = dma.hbm_to_vmem [thread:$0]  %s102_s0, 128, %s15_s7, [#allocation3]  }
   0xc   :  { %80 = dma.done.wait [#allocation3], 128  }
   0xd   :  { %81 = vsyncadd [#allocation3], 4294967168  ;;  %s85_s11 = smov [#allocation5]   ;;  %v21_v0 = vld [vmem:[#allocation2] sm:$0xff] }
   0xe   :  { %s29_s12 = sshll.u32 %s85_s11, 4  ;;  %22 = vst [vmem:[#allocation5] sm:$0xff] %v21_v0  ;;  %s30_s12 = int_to_ptr.vmem [resolvable:$true] %s29_s12 }
   0xf   :  { %s60_s13 = scalar_lea.vmem %s30_s12, 128  ;;  %p65_p6 = scmp.lt.s32.totalorder %s30_s12, %s30_s12 }
  0x10   :  { %p61_p5 = scmp.ne.s32.totalorder %s30_s12, %s60_s13  ;;  %p66_p7 = scmp.lt.s32.totalorder %s60_s13, %s60_s13 }
  0x12   :  { %p67_p8 = por %p66_p7, %p65_p6 }
  0x14   :  { %p68_p9 = pnand %p67_p8, %p61_p5 }
  0x16   :  { %71 = shalt.err (!%p68_p9)
}
  0x17   :  { %32 = dma.vmem_to_hbm [thread:$0]  %s30_s12, 128, %s103_s1, [#allocation4]  }
  0x18   :  { %82 = dma.done.wait [#allocation4], 128  }
  0x19   :  { %83 = vsyncadd [#allocation4], 4294967168 }
  0x1a   :  { %36 = vsyncpa [#allocation3], 1 }
  0x1b   :  { %37 = vsyncpa [#allocation4], 1 }

</bundles_post_ra>
